<compile_context>
chip_gen: v5e
topology: v5e:2x2
jax: 0.10.0
libtpu: 0.0.40
codegen_flags: <defaults>
</compile_context>

<pallas_src>
import jax
import jax.numpy as jnp
from jax.experimental import pallas as pl
from jax.experimental.pallas import tpu as pltpu


# ----------------------------------------------------------------------------
# Pallas kernel: y = W @ x + b   (one batch element, one spatial tile)
#   w_ref : [Cout, Cin]      (resident, bf16)
#   b_ref : [Cout, 1]        (resident, f32, broadcast over lanes)
#   x_ref : [Cin,  TILE_S]   (bf16)
#   o_ref : [Cout, TILE_S]   (f32)
# ----------------------------------------------------------------------------
def _conv1x1_kernel(w_ref, b_ref, x_ref, o_ref):
    y = jnp.dot(w_ref[...], x_ref[...], preferred_element_type=jnp.float32)
    o_ref[...] = (y + b_ref[...]).astype(o_ref.dtype)


def _round_up(x, m):
    return ((x + m - 1) // m) * m


def _vmem_capacity_bytes():
    """Generation-aware physical VMEM size; conservative (v7x) fallback."""
    try:
        return int(pltpu.get_tpu_info().vmem_capacity_bytes)
    except Exception:
        return 64 * 1024 * 1024


def _dimension_semantics(num_spatial_tiles):
    """Use CORE_PARALLEL on the spatial axis only on 2-TC chips (v7x)."""
    try:
        kind = jax.devices()[0].device_kind.lower()
    except Exception:
        kind = ""
    two_tc = any(tag in kind for tag in ("v7", "tpu7", "7x"))
    if two_tc and num_spatial_tiles >= 2:
        return (pltpu.PARALLEL, pltpu.CORE_PARALLEL)
    return (pltpu.PARALLEL, pltpu.PARALLEL)


def _spatial_tiling(hw, cin, cout, x_bytes, out_bytes, vmem_limit):
    """Pick (tile_s, hw_padded, n_tiles); tile_s is a multiple of 128."""
    hw128 = _round_up(hw, 128)
    # Double-buffered x + out blocks must fit comfortably inside the VMEM limit
    # (weights/bias are tiny and resident).
    per_lane_bytes = 2 * cin * x_bytes + 2 * cout * out_bytes
    max_by_vmem = max(((vmem_limit // 2) // per_lane_bytes) // 128 * 128, 128)
    # Target ~4 MiB per x block (16K-64K lanes for small Cin): amortizes the
    # ~0.35us per-grid-step overhead against per-step HBM time.
    target = max(((4 << 20) // (cin * x_bytes)) // 128 * 128, 128)
    desired = min(target, 64 * 1024, max_by_vmem, hw128)
    n_tiles = max(1, -(-hw128 // desired))               # ceil div
    tile_s = _round_up(-(-hw128 // n_tiles), 128)        # even split, 128-aligned
    hw_pad = n_tiles * tile_s
    return tile_s, hw_pad, n_tiles


def out_conv(x, w, b, *, compute_dtype=jnp.bfloat16):
    """1x1 convolution, NCHW in / NCHW out.

    x: [B, Cin, H, W] float32
    w: [Cout, Cin]    float32   (PyTorch Conv2d weight [Cout, Cin, 1, 1] squeezed)
    b: [Cout]         float32
    """
    B, Cin, H, W = x.shape
    Cout = w.shape[0]
    HW = H * W

    x_bytes = jnp.dtype(compute_dtype).itemsize
    out_bytes = 4  # fp32 output

    vmem_cap = _vmem_capacity_bytes()
    vmem_limit = max(min(int(0.75 * vmem_cap), 100 << 20), 32 << 20)

    tile_s, hw_pad, n_tiles = _spatial_tiling(
        HW, Cin, Cout, x_bytes, out_bytes, vmem_limit)

    # Layout plumbing (wrapper-side): flatten spatial, cast stream to bf16,
    # zero-pad the spatial axis to the tiled extent (sliced off afterwards).
    x2 = x.reshape(B, Cin, HW).astype(compute_dtype)
    if hw_pad != HW:
        x2 = jnp.pad(x2, ((0, 0), (0, 0), (0, hw_pad - HW)))
    w2 = w.astype(compute_dtype)
    b2 = b.reshape(Cout, 1).astype(jnp.float32)

    grid = (B, n_tiles)

    # Deeper input buffering only when tiles ended up small and numerous
    # (e.g. VMEM-capped on v7x with large Cin).
    x_spec_kwargs = {}
    if n_tiles >= 8 and Cin * tile_s * x_bytes <= (512 << 10):
        x_spec_kwargs["pipeline_mode"] = pl.Buffered(3)
    x_spec = pl.BlockSpec((None, Cin, tile_s), lambda bi, si: (bi, 0, si),
                          **x_spec_kwargs)

    cost = pl.CostEstimate(
        flops=2 * B * HW * Cin * Cout,
        transcendentals=0,
        bytes_accessed=(B * Cin * HW * x_bytes
                        + B * Cout * HW * out_bytes
                        + Cout * Cin * x_bytes
                        + Cout * 4),
    )

    out = pl.pallas_call(
        _conv1x1_kernel,
        out_shape=jax.ShapeDtypeStruct((B, Cout, hw_pad), jnp.float32),
        grid=grid,
        in_specs=[
            pl.BlockSpec((Cout, Cin), lambda bi, si: (0, 0)),   # weight, resident
            pl.BlockSpec((Cout, 1), lambda bi, si: (0, 0)),     # bias,   resident
            x_spec,
        ],
        out_specs=pl.BlockSpec((None, Cout, tile_s), lambda bi, si: (bi, 0, si)),
        compiler_params=pltpu.CompilerParams(
            dimension_semantics=_dimension_semantics(n_tiles),
            vmem_limit_bytes=vmem_limit,
        ),
        cost_estimate=cost,
    )(w2, b2, x2)

    if hw_pad != HW:
        out = out[:, :, :HW]
    return out.reshape(B, Cout, H, W)


# ----------------------------------------------------------------------------
if __name__ == "__main__":
    # OutConv(in_channels=16, out_channels=4) on a small NCHW input.
    B, CIN, COUT, H, W = 2, 16, 4, 16, 16

    key = jax.random.PRNGKey(0)
    kx, kw, kb = jax.random.split(key, 3)

    x = jax.random.normal(kx, (B, CIN, H, W), jnp.float32)

    # Match PyTorch Conv2d default init (uniform(-1/sqrt(fan_in), 1/sqrt(fan_in))).
    bound = 1.0 / (CIN ** 0.5)
    w = jax.random.uniform(kw, (COUT, CIN), jnp.float32, -bound, bound)
    b = jax.random.uniform(kb, (COUT,), jnp.float32, -bound, bound)

    out = out_conv(x, w, b)
    jax.block_until_ready(out)

    # Reference: the exact fp32 math of nn.Conv2d(kernel_size=1).
    ref = jnp.einsum("oc,bchw->bohw", w, x) + b[None, :, None, None]

    assert out.shape == (B, COUT, H, W), out.shape
    assert jnp.all(jnp.isfinite(out))
    # bf16 activation/weight stream with fp32 accumulation -> ~1e-3..1e-2 error.
    assert jnp.allclose(out, ref, atol=5e-2, rtol=5e-2), float(
        jnp.max(jnp.abs(out - ref)))
    print("KERNEL_OK")
</pallas_src>

<mosaic_0001>
module attributes {stable_mosaic.version = 11 : i64} {
  func.func @_conv1x1_kernel(%arg0: i32, %arg1: i32, %arg2: memref<4x16xbf16, #tpu.memory_space<vmem>>, %arg3: memref<4x1xf32, #tpu.memory_space<vmem>>, %arg4: memref<1x16x256xbf16, #tpu.memory_space<vmem>>, %arg5: memref<1x4x256xf32, #tpu.memory_space<vmem>>) attributes {dimension_semantics = [#tpu.dimension_semantics<parallel>, #tpu.dimension_semantics<parallel>], iteration_bounds = array<i64: 2, 1>, scalar_prefetch = 0 : i64, scratch_operands = 0 : i64, tpu.core_type = #tpu.core_type<tc>, window_params = [{pipeline_mode = #tpu.pipeline_mode<synchronous>, transform_indices = @transform_0, window_bounds = array<i64: 4, 16>}, {pipeline_mode = #tpu.pipeline_mode<synchronous>, transform_indices = @transform_1, window_bounds = array<i64: 4, 1>}, {transform_indices = @transform_2, window_bounds = array<i64: 1, 16, 256>}, {transform_indices = @transform_3, window_bounds = array<i64: 1, 4, 256>}]} {
    %c0 = arith.constant 0 : index
    %c0_0 = arith.constant 0 : index
    %0 = vector.load %arg2[%c0, %c0_0] : memref<4x16xbf16, #tpu.memory_space<vmem>>, vector<4x16xbf16>
    %c0_1 = arith.constant 0 : index
    %c0_2 = arith.constant 0 : index
    %c0_3 = arith.constant 0 : index
    %1 = vector.load %arg4[%c0_1, %c0_2, %c0_3] : memref<1x16x256xbf16, #tpu.memory_space<vmem>>, vector<1x16x256xbf16>
    %2 = vector.shape_cast %1 : vector<1x16x256xbf16> to vector<16x256xbf16>
    %cst = arith.constant dense<0.000000e+00> : vector<4x256xf32>
    %3 = tpu.matmul %0, %2, %cst {dimension_numbers = #tpu.dot_dimension_numbers<[1], [0], [0], [1], [0, 0, 1, 1], [], []>} : vector<4x16xbf16>, vector<16x256xbf16>, vector<4x256xf32> -> vector<4x256xf32>
    %c0_4 = arith.constant 0 : index
    %c0_5 = arith.constant 0 : index
    %4 = vector.load %arg3[%c0_4, %c0_5] : memref<4x1xf32, #tpu.memory_space<vmem>>, vector<4x1xf32>
    %5 = vector.broadcast %4 : vector<4x1xf32> to vector<4x256xf32>
    %6 = arith.addf %3, %5 : vector<4x256xf32>
    %c0_6 = arith.constant 0 : index
    %c0_7 = arith.constant 0 : index
    %c0_8 = arith.constant 0 : index
    %7 = vector.load %arg5[%c0_6, %c0_7, %c0_8] : memref<1x4x256xf32, #tpu.memory_space<vmem>>, vector<1x4x256xf32>
    %8 = vector.shape_cast %7 : vector<1x4x256xf32> to vector<4x256xf32>
    %9 = vector.shape_cast %6 : vector<4x256xf32> to vector<1x4x256xf32>
    tpu.vector_store %arg5[%c0_6, %c0_7, %c0_8], %9 {strides = array<i32>} : memref<1x4x256xf32, #tpu.memory_space<vmem>>, vector<1x4x256xf32>,
    return
  }
  func.func @transform_0(%arg0: i32, %arg1: i32) -> (i32, i32) {
    %c0_i32 = arith.constant 0 : i32
    %c0_i32_0 = arith.constant 0 : i32
    %c0_i32_1 = arith.constant 0 : i32
    return %c0_i32, %c0_i32_0 : i32, i32
  }
  func.func @transform_1(%arg0: i32, %arg1: i32) -> (i32, i32) {
    %c0_i32 = arith.constant 0 : i32
    %c0_i32_0 = arith.constant 0 : i32
    %c0_i32_1 = arith.constant 0 : i32
    return %c0_i32, %c0_i32_0 : i32, i32
  }
  func.func @transform_2(%arg0: i32, %arg1: i32) -> (i32, i32, i32) {
    %c0_i32 = arith.constant 0 : i32
    %c0_i32_0 = arith.constant 0 : i32
    return %arg0, %c0_i32, %arg1 : i32, i32, i32
  }
  func.func @transform_3(%arg0: i32, %arg1: i32) -> (i32, i32, i32) {
    %c0_i32 = arith.constant 0 : i32
    %c0_i32_0 = arith.constant 0 : i32
    return %arg0, %c0_i32, %arg1 : i32, i32, i32
  }
}

</mosaic_0001>

<bundles_post_ra>
// kernel: tpu_custom_call.1
= control target key start
LH: loop header
LB: loop body
LE: loop exit
PB: predicated region body
PF: predicated region fallthrough
CT: control target
= control target key end

     0   :  { %8 = vsyncpa [#allocation3], 0  ;;  %s730_s0 = inlined_call_operand.vmem [shape: bf16[4,16], index: 0, kind: input, shape index: {}]   ;;  %s731_s1 = inlined_call_operand.vmem [shape: f32[4,1], index: 1, kind: input, shape index: {}]   ;;  %s732_s2 = inlined_call_operand.hbm [shape: bf16[2,16,256], index: 2, kind: input, shape index: {}]   ;;  %s733_s3 = inlined_call_operand.hbm [shape: f32[2,4,256], index: 3, kind: output, shape index: {}]  }
   0x1   :  { %10 = vsyncpa [#allocation3 + $0x1], 0 }
   0x2   :  { %11 = vsyncpa [#allocation4], 0 }
   0x3   :  { %13 = vsyncpa [#allocation4 + $0x1], 0  ;;  %s603_s12 = smov 0   ;;  %s605_s13 = smov 0  }
   0x4   :  { %s607_s14 = smov 0   ;;  %s609_s15 = smov 0  }
   0x5   :  { %s611_s16 = smov 0   ;;  %s613_s17 = smov 0  }
   0x6 LB: > { %s371_s18 = sadd.s32 4294967295, %s578_s17   ;;  %s372_s19 = sadd.s32 4294967294, %s578_s17   ;;  %s578_s17 = sphi %s613_s17, %s19_s17   ;;  %s574_s16 = sphi %s611_s16, %s742_s16   ;;  %s570_s15 = sphi %s609_s15, %s741_s15   ;;  %s566_s14 = sphi %s607_s14, %s740_s14   ;;  %s562_s13 = sphi %s605_s13, %s739_s13   ;;  %s558_s12 = sphi %s603_s12, %s738_s12  }
   0x7   : > { %s31_s20 = sadd.s32 1, %s574_s16  ;;  %s82_s21 = sadd.s32 1, %s566_s14 }
   0x8   : > { %p33_p0 = scmp.ge.s32.totalorder %s31_s20, 2  ;;  %p89_p1 = scmp.ne.s32.totalorder %s566_s14, %s562_s13 }
   0x9   : > { %p90_p2 = scmp.eq.s32.totalorder %s578_s17, 0  ;;  %p95_p3 = scmp.ne.s32.totalorder %s562_s13, %s558_s12 }
   0xa   : > { %s744_s20 = smov (%p33_p0, %s31_s20), 0  ;;  %p96_p5 = scmp.eq.s32.totalorder %s371_s18, 0 }
   0xb   : > { %p644_p4 = por %p90_p2, %p89_p1  ;;  %s77_s23 = ssub.s32 %s574_s16, %s744_s20 }
   0xc   : > { %p121_p6 = scmp.eq.s32.totalorder %s371_s18, 1  ;;  %p80_p7 = scmp.eq.s32.totalorder %s77_s23, 0 }
   0xd   : > { %p650_p8 = por %p96_p5, %p95_p3  ;;  %p127_p10 = scmp.eq.s32.totalorder %s372_s19, 1 }
   0xe   : > { %p654_p9 = por %p121_p6, %p89_p1  ;;  %p374_p12 = scmp.ge.s32.totalorder %s578_s17, 2 }
   0xf   : > { %s659_s26 = scalar_select %p80_p7, %s566_s14, %s82_s21  }
  0x10   : > { %p661_p11 = por %p127_p10, %p95_p3  ;;  %p412_p13 = scmp.lt.s32.totalorder %s578_s17, 2 }
  0x11   : > { %s153_s28 = sand.u32 1, %s566_s14   ;;  %s396_s30 = sshll.u32 %s574_s16, 4 }
  0x12   : > { %s375_s29 = sshll.u32 %s153_s28, 4  ;;  %s164_s6 = scalar_lea.hbm %s732_s2, %s396_s30 }
  0x13   : > { %s157_s7 = scalar_lea.vmem [#allocation2], %s375_s29  ;;  %s165_s9 = sshll.u32 %s164_s6, 4  ;;  %s166_s9 = int_to_ptr.hbm [resolvable:$true] %s165_s9 }
  0x14   : > { %s167_s8 = sshll.u32 %s157_s7, 4  ;;  %p405_p0 = pnand %p412_p13, %p644_p4  ;;  %s168_s8 = int_to_ptr.vmem [resolvable:$true] %s167_s8 }
  0x15   : > { %p378_p1 = scmp.ge.s32.totalorder %s578_s17, 1  ;;  %s154_s10 = scalar_lea.sflag [#allocation3], %s153_s28 }
  0x16   : > { %s580_s11 = smov 128   ;;  %s581_s18 = smov 8  }
  0x17   : > { %407 = dma.hbm_to_vmem [thread:$0]  (!%p405_p0), %s166_s9, 256, %s168_s8, %s154_s10, %s580_s11, %s580_s11, %s581_s18  }
  0x18   : > { %p175_p2 = scmp.lt.s32.totalorder %s578_s17, 3 }
  0x1a   : > { %p176_p3 = pnand %p378_p1, %p175_p2 }
  0x1b   : > { %s677_s19 = sand.u32 (!%p176_p3), 1, %s562_s13  }
  0x1c   : > { %179 = sbr.rel (%p176_p3) target bundleno = 176 (0xb0), region = 32  ;;  %s379_s21 = sshll.u32 (!%p176_p3), %s677_s19, 4 }
  0x1d   : > { %s182_s23 = scalar_lea.sflag (!%p176_p3), [#allocation3], %s677_s19  ;;  %s185_s29 = scalar_lea.vmem (!%p176_p3), [#allocation2], %s379_s21 }
  0x21   : > { %549 = dma.done.wait (%p650_p8), %s182_s23, 256  }
  0x22   : > { %551 = vsyncadd (%p650_p8), %s182_s23, 4294967040  ;;  %v582_v0 = vmov 0   ;;  %v383_v1 = vld [vmem:[%s185_s29] sm:$0xf]  ;;  %v398_v2 = vld [vmem:[%s185_s29 + $0x4] sm:$0xf0] }
  0x23   : > { %465 = vset.pattern.permute.xlu0 %v582_v0  ;;  %v397_v3 = vld [vmem:[%s185_s29 + $0x4] sm:$0xf]  ;;  %v384_v4 = vor.u32 %v398_v2, %v383_v1  ;;  %v385_v5 = vld [vmem:[%s185_s29 + $0x8] sm:$0xf0]  ;;  %v215_v6 = vld [vmem:[%s731_s1] sm:$0xf] }
  0x24   : > { %v388_v7 = vor.u32 %v397_v3, %v385_v5  ;;  %218 = vperm.xlu0 %465, %v215_v6   ;;  %v212_v8 = vld [vmem:[%s730_s0] sm:$0x3]  ;;  %vm231_vm0 = vcmask 130048   ;;  %s380_s24 = sshll.u32 %s677_s19, 3  ;;  %s399_s5 = sshll.u32 %s570_s15, 3  ;;  %vm264_vm1 = vcmask 1043456  }
  0x25   : > { %242 = vmatpush.bf16.msra.mxu0 %v384_v4  ;;  %s282_s8 = scalar_lea.hbm %s733_s3, %s399_s5  ;;  %s208_s9 = scalar_lea.vmem [#allocation5], %s380_s24 }
  0x26   : > { %255 = vmatpush.bf16.msra.mxu1 %v388_v7  ;;  %s284_s10 = sshll.u32 %s208_s9, 4  ;;  %s286_s11 = sshll.u32 %s282_s8, 4  ;;  %s285_s10 = int_to_ptr.vmem [resolvable:$true] %s284_s10  ;;  %s287_s11 = int_to_ptr.hbm [resolvable:$true] %s286_s11 }
  0x27   : > { %s269_s15 = scalar_lea.sflag [#allocation4], %s677_s19  ;;  %s510_s18 = sshra.s32 %s287_s11, 4  ;;  %s511_s18 = int_to_ptr.hbm [resolvable:$true] %s510_s18 }
  0x28   : > { %389 = vmatmul.msk.bf16.vlgmr.msra.gmra.mxu0 %vm231_vm0, %v212_v8  ;;  %s512_s21 = scalar_lea.hbm %s511_s18, 8  ;;  %s516_s22 = scalar_lea.hbm %s733_s3, 16 }
  0x29   : > { %390 = vmatmul.msk.bf16.vlgmr.msra.gmra.mxu1 %vm231_vm0, %v212_v8  ;;  %p513_p4 = scmp.ne.s32.totalorder %s511_s18, %s512_s21  ;;  %p517_p7 = scmp.lt.s32.totalorder %s511_s18, %s733_s3 }
  0x2a   : > { %p518_p8 = scmp.lt.s32.totalorder %s516_s22, %s512_s21 }
  0x2b   : > { %p514_p5 = pnand %p513_p4, %p654_p9 }
  0x2c   : > { %p519_p10 = por %p518_p8, %p517_p7 }
  0x2d   : > { %p515_p6 = pneg %p514_p5 }
  0x2f   : > { %p520_p13 = pnand %p519_p10, %p515_p6 }
  0x96   : > { %v219_v9 = vpop.permute.xlu0 %218 }
  0xa5   : > { %v244_v10 = vpop.f32.mrf.mxu0 }
  0xa6   : > { %v257_v11 = vpop.f32.mrf.mxu1  ;;  %v245_v13 = vadd.f32 %v244_v10, %v219_v9 }
  0xa7   : > { %v258_v12 = vadd.f32 %v257_v11, %v219_v9 }
  0xa9   : > { %v263_v14 = vrot.slane %v258_v12, 4 }
  0xab   : > { %v265_v15 = vsel %vm264_vm1, %v245_v13, %v263_v14 }
  0xac   : > { %267 = vst [vmem:[%s208_s9] sm:$0xff] %v265_v15 }
  0xad   : > { %v246_v16 = vpop.f32.mrf.mxu0 }
  0xae   : > { %523 = shalt.err (!%p520_p13)
}
  0xaf   : > { %402 = dma.vmem_to_hbm [thread:$0]  (%p654_p9), %s285_s10, 128, %s287_s11, %s269_s15   ;;  %v259_v17 = vpop.f32.mrf.mxu1 }
  0xb0 PF: > { %s298_s19 = sand.u32 1, %s558_s12   ;;  %p409_p0 = pnand %p374_p12, %p661_p11 }
  0xb1   : > { %s299_s4 = scalar_lea.sflag [#allocation4], %s298_s19 }
  0xb2   : > { %p410_p1 = pneg %p409_p0 }
  0xb4   : > { %553 = dma.done.wait (%p410_p1), %s299_s4, 128  }
  0xb5   : > { %555 = vsyncadd (%p410_p1), %s299_s4, 4294967168  ;;  %s19_s17 = sadd.s32 1, %s578_s17   ;;  %s738_s12 = smov %s562_s13 }
  0xb6   : > { %p16_p2 = scmp.ge.s32.totalorder %s19_s17, 4   ;;  %s739_s13 = smov %s566_s14 }
  0xb7   : > { %s740_s14 = smov %s659_s26  ;;  %s741_s15 = smov %s574_s16 }
  0xb8   : > { %s742_s16 = smov %s744_s20  ;;  %18 = sbr.rel (!%p16_p2) target bundleno = 6 (0x6), region = 77 }
  0xbd   :  { %305 = vsyncpa [#allocation3], 1 }
  0xbe   :  { %307 = vsyncpa [#allocation3 + $0x1], 1 }
  0xbf   :  { %308 = vsyncpa [#allocation4], 1 }
  0xc0   :  { %310 = vsyncpa [#allocation4 + $0x1], 1 }

</bundles_post_ra>
